<compile_context>
chip_gen: v6e
topology: v6e:2x2x1
jax: 0.10.0
libtpu: 0.0.40
codegen_flags: <defaults>
</compile_context>

<pallas_src>
import math
from functools import partial

import jax
import jax.numpy as jnp
from jax.experimental import pallas as pl
from jax.experimental.pallas import tpu as pltpu


# ---------------- pe buffer (identical to the PyTorch __init__) ----------------

def make_positional_encoding(d_model: int, max_len: int = 5000) -> jnp.ndarray:
    position = jnp.arange(max_len, dtype=jnp.float32)[:, None]                  # (max_len, 1)
    div_term = jnp.exp(
        jnp.arange(0, d_model, 2, dtype=jnp.float32) * (-math.log(10000.0) / d_model)
    )                                                                           # (d_model/2,)
    pe = jnp.zeros((max_len, 1, d_model), dtype=jnp.float32)
    pe = pe.at[:, 0, 0::2].set(jnp.sin(position * div_term))
    pe = pe.at[:, 0, 1::2].set(jnp.cos(position * div_term))
    return pe


# ---------------- Pallas kernels (shared by both layout paths) ----------------

def _add_kernel(x_ref, pe_ref, o_ref):
    # Both refs are (tS, W) tiles with identical layout -> plain VPU add.
    o_ref[...] = (x_ref[...] + pe_ref[...]).astype(o_ref.dtype)


def _add_dropout_kernel(x_ref, pe_ref, bits_ref, o_ref, *, threshold, scale):
    # Inverted dropout: keep iff bits >= p * 2^32 (single unsigned compare),
    # survivors scaled by 1/(1-p).  All math stays in x.dtype.
    y = x_ref[...] + pe_ref[...]
    keep = bits_ref[...] >= jnp.uint32(threshold)
    o_ref[...] = jnp.where(
        keep, y * jnp.asarray(scale, dtype=y.dtype), jnp.zeros_like(y)
    ).astype(o_ref.dtype)


# ---------------- sizing helpers ----------------

_VMEM_LIMIT_CACHE = []


def _vmem_limit_bytes() -> int:
    """Per-generation scoped-VMEM limit (conservative default = v7x)."""
    if not _VMEM_LIMIT_CACHE:
        limit = 48 * 1024 * 1024                      # v7x: 64 MiB physical VMEM
        try:
            cap = int(getattr(pltpu.get_tpu_info(), "vmem_capacity_bytes", 0) or 0)
            if cap >= 96 * 1024 * 1024:               # v5e / v6e: 128 MiB physical
                limit = 64 * 1024 * 1024
        except Exception:
            pass                                      # CPU / interpret: keep default
        _VMEM_LIMIT_CACHE.append(limit)
    return _VMEM_LIMIT_CACHE[0]


def _seq_tile(S: int, per_row_bytes: int, vmem_limit: int) -> int:
    """Largest multiple-of-8 sequence tile whose double-buffered working set
    (all tiled inputs + the output) stays within ~75% of the VMEM limit."""
    usable = (3 * vmem_limit) // 4                    # headroom for scratch/padding
    rows = usable // (2 * max(1, per_row_bytes))      # x2: double buffering
    rows = max(8, (rows // 8) * 8)                    # (8,128) rule for 2-D pe block
    return int(S) if rows >= S else int(rows)


def _compiler_params(grid):
    return pltpu.CompilerParams(
        dimension_semantics=("parallel",) * len(grid),
        vmem_limit_bytes=_vmem_limit_bytes(),
    )


# ---------------- forward wrapper ----------------

def positional_encoding_forward(x, pe, *, dropout_p: float = 0.1,
                                training: bool = False, rng_key=None):
    """Forward of PositionalEncoding: (x + pe[:S]) then (optional) dropout.

    x: (S, B, D) seq-first; pe: (max_len, 1, D) from make_positional_encoding.
    NOTE: x is aliased to the output (in-place add); do not reuse x afterwards.
    """
    S, B, D = x.shape
    itemsize = jnp.dtype(x.dtype).itemsize
    vmem_limit = _vmem_limit_bytes()
    pe_2d = pe[:S, 0, :].astype(x.dtype)              # (S, D), mirrors self.pe[:x.size(0)]

    use_dropout = bool(training) and float(dropout_p) > 0.0
    if use_dropout:
        if rng_key is None:
            rng_key = jax.random.PRNGKey(0)
        bits = jax.random.bits(rng_key, (S, B, D), dtype=jnp.uint32)
        threshold = min(int(round(float(dropout_p) * 2.0 ** 32)), 2 ** 32 - 1)
        scale = 1.0 / (1.0 - float(dropout_p))
        kernel = partial(_add_dropout_kernel, threshold=threshold, scale=scale)
    else:
        bits = None
        kernel = _add_kernel

    if D < 128:
        # ---- Small-d_model path: fold batch into lanes (free reshape of x). ----
        W = B * D
        x_op = x.reshape(S, W)
        pe_op = jnp.broadcast_to(pe_2d[:, None, :], (S, B, D)).reshape(S, W)
        per_row = W * itemsize * 3 + (W * 4 if use_dropout else 0)
        tS = _seq_tile(S, per_row, vmem_limit)
        grid = (pl.cdiv(S, tS),)
        spec_2d = pl.BlockSpec((tS, W), lambda i: (i, 0))

        ops = (x_op, pe_op)
        in_specs = [spec_2d, spec_2d]
        if use_dropout:
            ops = ops + (bits.reshape(S, W),)
            in_specs.append(pl.BlockSpec((tS, W), lambda i: (i, 0)))

        out = pl.pallas_call(
            kernel,
            out_shape=jax.ShapeDtypeStruct((S, W), x.dtype),
            grid_spec=pltpu.PrefetchScalarGridSpec(
                num_scalar_prefetch=0, grid=grid,
                in_specs=in_specs, out_specs=spec_2d),
            compiler_params=_compiler_params(grid),
            input_output_aliases={0: 0},
        )(*ops)
        return out.reshape(S, B, D)

    # ---- Main path: (seq-tile, batch) grid with the batch block dim squeezed. ----
    per_row = D * itemsize * 3 + (D * 4 if use_dropout else 0)
    tS = _seq_tile(S, per_row, vmem_limit)
    grid = (pl.cdiv(S, tS), B)        # batch innermost -> pe tile reused across B steps
    x_spec = pl.BlockSpec((tS, None, D), lambda i, b: (i, b, 0))   # kernel sees (tS, D)
    pe_spec = pl.BlockSpec((tS, D), lambda i, b: (i, 0))

    ops = (x, pe_2d)
    in_specs = [x_spec, pe_spec]
    if use_dropout:
        ops = ops + (bits,)
        in_specs.append(pl.BlockSpec((tS, None, D), lambda i, b: (i, b, 0)))

    return pl.pallas_call(
        kernel,
        out_shape=jax.ShapeDtypeStruct((S, B, D), x.dtype),
        grid_spec=pltpu.PrefetchScalarGridSpec(
            num_scalar_prefetch=0, grid=grid,
            in_specs=in_specs, out_specs=x_spec),
        compiler_params=_compiler_params(grid),
        input_output_aliases={0: 0},
    )(*ops)


# ---------------- demo / self-check ----------------

if __name__ == "__main__":
    key = jax.random.PRNGKey(0)
    p = 0.1
    configs = [
        # (name, S, B, D) -- small module-like shape (fold path) and a
        # lane-dense shape (squeezed-batch path).
        ("fold_D<128", 8, 2, 32),
        ("lane_dense", 16, 4, 128),
    ]

    for name, S, B, D in configs:
        pe = make_positional_encoding(D, max_len=5000)
        key, k_eval, k_train, k_drop = jax.random.split(key, 4)

        # --- Eval mode (dropout identity): deterministic, verified vs reference.
        x = jax.random.normal(k_eval, (S, B, D), dtype=jnp.float32)
        ref = x + pe[:S]                      # reference BEFORE the (aliased) call
        out = jax.block_until_ready(
            positional_encoding_forward(x, pe, dropout_p=p, training=False))
        assert out.shape == (S, B, D) and out.dtype == jnp.float32
        assert jnp.allclose(out, ref, atol=1e-6), f"{name}: eval-mode mismatch"

        # --- Training mode: every element is either exactly 0 or ref * 1/(1-p).
        x2 = jax.random.normal(k_train, (S, B, D), dtype=jnp.float32)
        ref2 = x2 + pe[:S]
        out2 = jax.block_until_ready(
            positional_encoding_forward(x2, pe, dropout_p=p, training=True,
                                        rng_key=k_drop))
        assert out2.shape == (S, B, D) and out2.dtype == jnp.float32
        scale = 1.0 / (1.0 - p)
        kept = jnp.abs(out2 - ref2 * scale) < 1e-4
        dropped = jnp.abs(out2) == 0.0
        assert bool(jnp.all(kept | dropped)), f"{name}: training output not {{0, scaled}}"

    print("KERNEL_OK")
</pallas_src>

<mosaic_0001>
module attributes {stable_mosaic.version = 11 : i64} {
  func.func @_add_kernel(%arg0: i32, %arg1: memref<8x64xf32, #tpu.memory_space<vmem>>, %arg2: memref<8x64xf32, #tpu.memory_space<vmem>>, %arg3: memref<8x64xf32, #tpu.memory_space<vmem>>) attributes {dimension_semantics = [#tpu.dimension_semantics<parallel>], iteration_bounds = array<i64: 1>, scalar_prefetch = 0 : i64, scratch_operands = 0 : i64, tpu.core_type = #tpu.core_type<tc>, window_params = [{transform_indices = @transform_0, window_bounds = array<i64: 8, 64>}, {transform_indices = @transform_1, window_bounds = array<i64: 8, 64>}, {transform_indices = @transform_2, window_bounds = array<i64: 8, 64>}]} {
    %c0 = arith.constant 0 : index
    %c0_0 = arith.constant 0 : index
    %0 = vector.load %arg1[%c0, %c0_0] : memref<8x64xf32, #tpu.memory_space<vmem>>, vector<8x64xf32>
    %c0_1 = arith.constant 0 : index
    %c0_2 = arith.constant 0 : index
    %1 = vector.load %arg2[%c0_1, %c0_2] : memref<8x64xf32, #tpu.memory_space<vmem>>, vector<8x64xf32>
    %2 = arith.addf %0, %1 : vector<8x64xf32>
    %c0_3 = arith.constant 0 : index
    %c0_4 = arith.constant 0 : index
    %3 = vector.load %arg3[%c0_3, %c0_4] : memref<8x64xf32, #tpu.memory_space<vmem>>, vector<8x64xf32>
    tpu.vector_store %arg3[%c0_3, %c0_4], %2 {strides = array<i32>} : memref<8x64xf32, #tpu.memory_space<vmem>>, vector<8x64xf32>,
    return
  }
  func.func @transform_0(%arg0: i32) -> (i32, i32) {
    %c0_i32 = arith.constant 0 : i32
    %c0_i32_0 = arith.constant 0 : i32
    return %arg0, %c0_i32 : i32, i32
  }
  func.func @transform_1(%arg0: i32) -> (i32, i32) {
    %c0_i32 = arith.constant 0 : i32
    %c0_i32_0 = arith.constant 0 : i32
    return %arg0, %c0_i32 : i32, i32
  }
  func.func @transform_2(%arg0: i32) -> (i32, i32) {
    %c0_i32 = arith.constant 0 : i32
    %c0_i32_0 = arith.constant 0 : i32
    return %arg0, %c0_i32 : i32, i32
  }
}

</mosaic_0001>

<bundles_post_ra>
// kernel: tpu_custom_call.1
= control target key start
LH: loop header
LB: loop body
LE: loop exit
PB: predicated region body
PF: predicated region fallthrough
CT: control target
= control target key end

     0   :  { %7 = vsyncpa [#allocation3], 0  ;;  %s116_s0 = inlined_call_operand.hbm [shape: f32[8,64], index: 0, kind: input, shape index: {}, may-alias: {0,2}]   ;;  %s117_s1 = inlined_call_operand.vmem [shape: f32[8,64], index: 1, kind: input, shape index: {}]   ;;  %s118_s2 = inlined_call_operand.hbm [shape: f32[8,64], index: 2, kind: output, shape index: {}, may-alias: {0,2}]  }
   0x1   :  { %8 = vsyncpa [#allocation4], 0  ;;  %s90_s9 = smov [#allocation2]  }
   0x2   :  { %s15_s10 = sshll.u32 %s90_s9, 4  ;;  %s16_s10 = int_to_ptr.vmem [resolvable:$true] %s15_s10 }
   0x3   :  { %s54_s11 = scalar_lea.vmem %s16_s10, 128  ;;  %p59_p1 = scmp.lt.s32.totalorder %s16_s10, %s16_s10 }
   0x4   :  { %p55_p0 = scmp.ne.s32.totalorder %s16_s10, %s54_s11  ;;  %p60_p2 = scmp.lt.s32.totalorder %s54_s11, %s54_s11 }
   0x6   :  { %p61_p3 = por %p60_p2, %p59_p1 }
   0x8   :  { %p62_p4 = pnand %p61_p3, %p55_p0 }
   0xa   :  { %65 = shalt.err (!%p62_p4)
}
   0xb   :  { %18 = dma.hbm_to_vmem [thread:$0]  %s116_s0, 128, %s16_s10, [#allocation3]  }
   0xc   :  { %86 = dma.done.wait [#allocation3], 128  }
   0xd   :  { %87 = vsyncadd [#allocation3], 4294967168  ;;  %s91_s14 = smov [#allocation5]   ;;  %v24_v0 = vld [vmem:[#allocation2] sm:$0xff]  ;;  %vm27_vm0 = vcmask 523264  }
   0xe   :  { %s35_s15 = sshll.u32 %s91_s14, 4  ;;  %v25_v1 = vld [vmem:[%s117_s1] sm:$0xff]  ;;  %s36_s15 = int_to_ptr.vmem [resolvable:$true] %s35_s15 }
   0xf   :  { %v26_v2 = vadd.f32 %v25_v1, %v24_v0  ;;  %s66_s18 = scalar_lea.vmem %s36_s15, 128  ;;  %p71_p6 = scmp.lt.s32.totalorder %s36_s15, %s36_s15 }
  0x10   :  { %p67_p5 = scmp.ne.s32.totalorder %s36_s15, %s66_s18  ;;  %p72_p7 = scmp.lt.s32.totalorder %s66_s18, %s66_s18 }
  0x11   :  { %28 = vst.msk [vmem:[#allocation5] sm:$0xff] %vm27_vm0, %v26_v2 }
  0x12   :  { %p73_p8 = por %p72_p7, %p71_p6 }
  0x14   :  { %p74_p9 = pnand %p73_p8, %p67_p5 }
  0x16   :  { %77 = shalt.err (!%p74_p9)
}
  0x17   :  { %38 = dma.vmem_to_hbm [thread:$0]  %s36_s15, 128, %s118_s2, [#allocation4]  }
  0x18   :  { %88 = dma.done.wait [#allocation4], 128  }
  0x19   :  { %89 = vsyncadd [#allocation4], 4294967168 }
  0x1a   :  { %42 = vsyncpa [#allocation3], 1 }
  0x1b   :  { %43 = vsyncpa [#allocation4], 1 }

</bundles_post_ra>
